<compile_context>
chip_gen: v7x
topology: tpu7x:2x2x1
jax: 0.10.0
libtpu: 0.0.40
codegen_flags: <defaults>
</compile_context>

<pallas_src>
import jax
import jax.numpy as jnp
from jax.experimental import pallas as pl
from jax.experimental.pallas import tpu as pltpu


def linear_kernel(w_ref, b_ref, x_ref, o_ref):
    # w_ref: [1, 2] f32 in SMEM  (PyTorch nn.Linear layout [OUT, IN])
    # b_ref: [1]    f32 in SMEM
    # x_ref: [B, 2] f32 in VMEM
    # o_ref: [B, 1] f32 in VMEM
    w0 = w_ref[0, 0]          # scalar reads from SMEM
    w1 = w_ref[0, 1]
    b = b_ref[0]
    x = x_ref[...]            # [B, 2]
    # y = x @ W.T + b, done entirely on the VPU (scalar-broadcast mul/add).
    y = x[:, 0:1] * w0 + x[:, 1:2] * w1 + b
    o_ref[...] = y.astype(o_ref.dtype)


def linear_pallas(x, weight, bias):
    """x: [B, 2] f32, weight: [1, 2] f32 (PyTorch [OUT, IN]), bias: [1] f32."""
    B, IN = x.shape
    OUT = weight.shape[0]
    assert IN == 2 and OUT == 1, "kernel is specialized to nn.Linear(2, 1)"
    return pl.pallas_call(
        linear_kernel,
        out_shape=jax.ShapeDtypeStruct((B, OUT), x.dtype),
        in_specs=[
            pl.BlockSpec(memory_space=pltpu.MemorySpace.SMEM),   # weight (scalars)
            pl.BlockSpec(memory_space=pltpu.MemorySpace.SMEM),   # bias (scalar)
            pl.BlockSpec(memory_space=pltpu.MemorySpace.VMEM),   # x (full block)
        ],
        out_specs=pl.BlockSpec(memory_space=pltpu.MemorySpace.VMEM),
    )(weight, bias, x)


if __name__ == "__main__":
    # Deterministic parameter init (synthetic, matches nn.Linear(2, 1) shapes).
    key = jax.random.PRNGKey(0)
    kx, kw, kb = jax.random.split(key, 3)

    B, IN, OUT = 8, 2, 1
    x = jax.random.normal(kx, (B, IN), dtype=jnp.float32)
    weight = jax.random.normal(kw, (OUT, IN), dtype=jnp.float32) * 0.5   # [1, 2]
    bias = jax.random.normal(kb, (OUT,), dtype=jnp.float32) * 0.1        # [1]

    y = linear_pallas(x, weight, bias)
    jax.block_until_ready(y)

    # Reference check against plain JAX (same math as PyTorch forward).
    y_ref = x @ weight.T + bias
    assert y.shape == (B, OUT)
    assert jnp.allclose(y, y_ref, atol=1e-5, rtol=1e-5)

    print("KERNEL_OK")
</pallas_src>

<mosaic_0001>
module attributes {stable_mosaic.version = 11 : i64} {
  func.func @linear_kernel(%arg0: memref<1x2xf32, #tpu.memory_space<smem>>, %arg1: memref<1xf32, #tpu.memory_space<smem>>, %arg2: memref<8x2xf32, #tpu.memory_space<vmem>>, %arg3: memref<8x1xf32, #tpu.memory_space<vmem>>) attributes {dimension_semantics = [], scalar_prefetch = 0 : i64, scratch_operands = 0 : i64, tpu.core_type = #tpu.core_type<tc>} {
    %c0 = arith.constant 0 : index
    %c0_0 = arith.constant 0 : index
    %0 = memref.load %arg0[%c0, %c0_0] : memref<1x2xf32, #tpu.memory_space<smem>>
    %c0_1 = arith.constant 0 : index
    %c1 = arith.constant 1 : index
    %1 = memref.load %arg0[%c0_1, %c1] : memref<1x2xf32, #tpu.memory_space<smem>>
    %c0_2 = arith.constant 0 : index
    %2 = memref.load %arg1[%c0_2] : memref<1xf32, #tpu.memory_space<smem>>
    %c0_3 = arith.constant 0 : index
    %c0_4 = arith.constant 0 : index
    %3 = vector.load %arg2[%c0_3, %c0_4] : memref<8x2xf32, #tpu.memory_space<vmem>>, vector<8x2xf32>
    %4 = vector.extract_strided_slice %3 {offsets = [0, 0], sizes = [8, 1], strides = [1, 1]} : vector<8x2xf32> to vector<8x1xf32>
    %5 = vector.broadcast %0 : f32 to vector<8x1xf32>
    %6 = arith.mulf %4, %5 : vector<8x1xf32>
    %7 = vector.extract_strided_slice %3 {offsets = [0, 1], sizes = [8, 1], strides = [1, 1]} : vector<8x2xf32> to vector<8x1xf32>
    %8 = vector.broadcast %1 : f32 to vector<8x1xf32>
    %9 = arith.mulf %7, %8 : vector<8x1xf32>
    %10 = arith.addf %6, %9 : vector<8x1xf32>
    %11 = vector.broadcast %2 : f32 to vector<8x1xf32>
    %12 = arith.addf %10, %11 : vector<8x1xf32>
    %c0_5 = arith.constant 0 : index
    %c0_6 = arith.constant 0 : index
    %13 = vector.load %arg3[%c0_5, %c0_6] : memref<8x1xf32, #tpu.memory_space<vmem>>, vector<8x1xf32>
    tpu.vector_store %arg3[%c0_5, %c0_6], %12 {strides = array<i32>} : memref<8x1xf32, #tpu.memory_space<vmem>>, vector<8x1xf32>,
    return
  }
}

</mosaic_0001>

<bundles_post_ra>
// kernel: tpu_custom_call.1
= control target key start
LH: loop header
LB: loop body
LE: loop exit
PB: predicated region body
PF: predicated region fallthrough
CT: control target
= control target key end

     0   :  { %9 = vsyncpa [#allocation4], 0  ;;  %s101_s0 = inlined_call_operand.vmem [shape: f32[1,2], index: 0, kind: input, shape index: {}]   ;;  %s102_s1 = inlined_call_operand.<no memory space> [shape: f32[1], index: 1, kind: input, shape index: {}]   ;;  %s103_s2 = inlined_call_operand.vmem [shape: f32[8,2], index: 2, kind: input, shape index: {}]   ;;  %s104_s3 = inlined_call_operand.vmem [shape: f32[8,1], index: 3, kind: output, shape index: {}]  }
   0x1   :  { %s16_s14 = sshll.u32 %s101_s0, 4  ;;  %s17_s14 = int_to_ptr.vmem [resolvable:$true] %s16_s14 }
   0x2   :  { %s53_s15 = scalar_lea.vmem %s17_s14, 16  ;;  %p58_p1 = scmp.lt.s32.totalorder %s17_s14, %s17_s14 }
   0x3   :  { %p54_p0 = scmp.ne.s32.totalorder %s17_s14, %s53_s15  ;;  %p59_p2 = scmp.lt.s32.totalorder %s53_s15, %s53_s15 }
   0x5   :  { %p60_p3 = por %p59_p2, %p58_p1 }
   0x7   :  { %p61_p4 = pnand %p60_p3, %p54_p0 }
   0x9   :  { %64 = shalt.err (!%p61_p4)
}
   0xa   :  { %s67_s16 = smov [#allocation3]  }
   0xb   :  { %19 = dma.vmem_to_smem %s17_s14, 16, %s67_s16, [#allocation4]  }
   0xc   :  { %65 = dma.done.wait [#allocation4], 16  }
   0xd   :  { %66 = vsyncadd [#allocation4], 4294967280 }
   0xe   :  { %27 = sfence }
   0xf   :  { %s50_s17 = sld [smem:[#allocation3 + $0x1]]  ;;  %v31_v0 = vld [vmem:[%s103_s2] sm:$0xff]  ;;  %s68_s0 = smov 127   ;;  %v41_v6 = vstv %s102_s1  ;;  %vm43_vm0 = vcmask 7168  }
  0x10   :  { %s28_s20 = sld [smem:[#allocation3]] }
  0x15   :  { %v34_v1 = vstv %s50_s17 }
  0x16   :  { %v35_v2 = vmul.f32 %v34_v1, %v31_v0  ;;  %v32_v3 = vstv %s28_s20 }
  0x17   :  { %v33_v4 = vmul.f32 %v32_v3, %v31_v0 }
  0x18   :  { %37 = vrot.lane.b32.xlu0 %v35_v2, %s68_s0 }
  0x8a   :  { %v38_v5 = vpop.permute.xlu0 %37 }
  0x8b   :  { %v40_v7 = vadd.f32 %v38_v5, %v33_v4 }
  0x8d   :  { %v42_v8 = vadd.f32 %v41_v6, %v40_v7 }
  0x8f   :  { %44 = vst.msk [vmem:[%s104_s3] sm:$0xff] %vm43_vm0, %v42_v8 }
  0x90   :  { %49 = vsyncpa [#allocation4], 1 }

</bundles_post_ra>
